<compile_context>
chip_gen: v7x
topology: tpu7x:2x2x1
jax: 0.10.0
libtpu: 0.0.40
codegen_flags: <defaults>
</compile_context>

<pallas_src>
import functools

import jax
import jax.numpy as jnp
from jax.experimental import pallas as pl
from jax.experimental.pallas import tpu as pltpu


def _fused_mlp_kernel(*refs, n_layers: int):
    # refs: x_ref, w0, b0, w1, b1, ..., w_{L-1}, b_{L-1}, o_ref
    x_ref = refs[0]
    o_ref = refs[-1]
    h = x_ref[...]                         # keep input dtype (f32 or bf16) for the MXU
    for li in range(n_layers):
        w = refs[1 + 2 * li][...]          # (Din_l, Dout_l)
        b = refs[2 + 2 * li][...].astype(jnp.float32)  # (1, Dout_l) broadcast
        h = jnp.dot(h, w, preferred_element_type=jnp.float32) + b
        if li != n_layers - 1:
            h = jnp.maximum(h, 0.0)        # ReLU on hidden layers only
    o_ref[...] = h.astype(o_ref.dtype)


def _round_up(x, m):
    return -(-x // m) * m


def mlp_forward_pallas(x, params, *, max_batch_tile: int = 1024):
    """Fused flatten + MLP forward. params = [(W_in_out, b), ...]."""
    B = x.shape[0]
    x2 = x.reshape(B, -1)                  # free relayout, no HBM pass
    Din = x2.shape[1]
    n_layers = len(params)
    out_dim = params[-1][0].shape[1]

    # Batch tile selection:
    #  * B <= 8: single full-B block (block == full array dims is always legal).
    #  * otherwise: aim for >= 2 grid steps (v7x megacore) with sublane-aligned
    #    tiles, capped at max_batch_tile (1024) for HBM roofline / VMEM safety.
    # No padding: grid = cdiv(B, tm); the ragged tail block's OOB reads are
    # padded with undefined values and its OOB writes are masked (rows are
    # independent, so this is semantically safe).
    if B <= 8:
        tm = B
    else:
        tm = min(max_batch_tile, _round_up(pl.cdiv(B, 2), 8))
    grid = (pl.cdiv(B, tm),)

    in_specs = [pl.BlockSpec((tm, Din), lambda i: (i, 0))]
    flat_args = [x2]
    for (w, b) in params:
        din_l, dout_l = w.shape
        # Weights/biases: one resident full-array block each (constant index
        # map -> fetched once, not re-DMA'd per batch tile).
        in_specs.append(pl.BlockSpec((din_l, dout_l), lambda i: (0, 0)))
        in_specs.append(pl.BlockSpec((1, dout_l), lambda i: (0, 0)))
        flat_args.append(w)
        flat_args.append(b.reshape(1, dout_l))

    kernel = functools.partial(_fused_mlp_kernel, n_layers=n_layers)
    out = pl.pallas_call(
        kernel,
        out_shape=jax.ShapeDtypeStruct((B, out_dim), x.dtype),
        grid=grid,
        in_specs=in_specs,
        out_specs=pl.BlockSpec((tm, out_dim), lambda i: (i, 0)),
        compiler_params=pltpu.CompilerParams(
            # Batch tiles are independent -> shard across TCs on v7x.
            dimension_semantics=("parallel",),
        ),
    )(*flat_args)
    return out


mlp_forward = jax.jit(mlp_forward_pallas)


def init_mlp_params(key, input_dim, hidden_sizes, num_classes, dtype=jnp.float32):
    """Deterministic init matching nn.Linear shapes (Kaiming-uniform bounds)."""
    num_inputs = 1
    for d in input_dim:
        num_inputs *= d
    sizes = [num_inputs] + list(hidden_sizes) + [num_classes]
    params = []
    for i in range(len(sizes) - 1):
        fan_in, fan_out = sizes[i], sizes[i + 1]
        key, kw, kb = jax.random.split(key, 3)
        bound = 1.0 / (fan_in ** 0.5)
        # Stored as (in, out) == transpose of torch's (out, in).
        w = jax.random.uniform(kw, (fan_in, fan_out), dtype, -bound, bound)
        b = jax.random.uniform(kb, (fan_out,), dtype, -bound, bound)
        params.append((w, b))
    return params


if __name__ == "__main__":
    key = jax.random.PRNGKey(0)

    dataset_info = {"input_dim": (4, 16, 16), "num_classes": 10}
    hidden_sizes = [32, 32]

    k_params, k_x = jax.random.split(key)
    params = init_mlp_params(
        k_params, dataset_info["input_dim"], hidden_sizes,
        dataset_info["num_classes"],
    )

    batch = 2
    x = jax.random.normal(k_x, (batch, *dataset_info["input_dim"]), jnp.float32)

    out = mlp_forward(x, params)
    out = jax.block_until_ready(out)

    # Reference check in plain JAX (same math).
    h = x.reshape(batch, -1)
    for li, (w, b) in enumerate(params):
        h = h @ w + b
        if li != len(params) - 1:
            h = jnp.maximum(h, 0.0)
    assert out.shape == (batch, dataset_info["num_classes"])
    assert jnp.allclose(out, h, atol=1e-4, rtol=1e-4)

    print("KERNEL_OK")
</pallas_src>

<mosaic_0001>
module attributes {stable_mosaic.version = 11 : i64} {
  func.func @_fused_mlp_kernel(%arg0: i32, %arg1: memref<2x1024xf32, #tpu.memory_space<vmem>>, %arg2: memref<1024x32xf32, #tpu.memory_space<vmem>>, %arg3: memref<1x32xf32, #tpu.memory_space<vmem>>, %arg4: memref<32x32xf32, #tpu.memory_space<vmem>>, %arg5: memref<1x32xf32, #tpu.memory_space<vmem>>, %arg6: memref<32x10xf32, #tpu.memory_space<vmem>>, %arg7: memref<1x10xf32, #tpu.memory_space<vmem>>, %arg8: memref<2x10xf32, #tpu.memory_space<vmem>>) attributes {dimension_semantics = [#tpu.dimension_semantics<parallel>], iteration_bounds = array<i64: 1>, scalar_prefetch = 0 : i64, scratch_operands = 0 : i64, tpu.core_type = #tpu.core_type<tc>, window_params = [{transform_indices = @transform_0, window_bounds = array<i64: 2, 1024>}, {pipeline_mode = #tpu.pipeline_mode<synchronous>, transform_indices = @transform_1, window_bounds = array<i64: 1024, 32>}, {pipeline_mode = #tpu.pipeline_mode<synchronous>, transform_indices = @transform_2, window_bounds = array<i64: 1, 32>}, {pipeline_mode = #tpu.pipeline_mode<synchronous>, transform_indices = @transform_3, window_bounds = array<i64: 32, 32>}, {pipeline_mode = #tpu.pipeline_mode<synchronous>, transform_indices = @transform_4, window_bounds = array<i64: 1, 32>}, {pipeline_mode = #tpu.pipeline_mode<synchronous>, transform_indices = @transform_5, window_bounds = array<i64: 32, 10>}, {pipeline_mode = #tpu.pipeline_mode<synchronous>, transform_indices = @transform_6, window_bounds = array<i64: 1, 10>}, {transform_indices = @transform_7, window_bounds = array<i64: 2, 10>}]} {
    %c0 = arith.constant 0 : index
    %c0_0 = arith.constant 0 : index
    %0 = vector.load %arg1[%c0, %c0_0] : memref<2x1024xf32, #tpu.memory_space<vmem>>, vector<2x1024xf32>
    %c0_1 = arith.constant 0 : index
    %c0_2 = arith.constant 0 : index
    %1 = vector.load %arg2[%c0_1, %c0_2] : memref<1024x32xf32, #tpu.memory_space<vmem>>, vector<1024x32xf32>
    %c0_3 = arith.constant 0 : index
    %c0_4 = arith.constant 0 : index
    %2 = vector.load %arg3[%c0_3, %c0_4] : memref<1x32xf32, #tpu.memory_space<vmem>>, vector<1x32xf32>
    %cst = arith.constant dense<0.000000e+00> : vector<2x32xf32>
    %3 = tpu.matmul %0, %1, %cst {dimension_numbers = #tpu.dot_dimension_numbers<[1], [0], [0], [1], [0, 0, 1, 1], [], []>} : vector<2x1024xf32>, vector<1024x32xf32>, vector<2x32xf32> -> vector<2x32xf32>
    %4 = vector.broadcast %2 : vector<1x32xf32> to vector<2x32xf32>
    %5 = arith.addf %3, %4 : vector<2x32xf32>
    %cst_5 = arith.constant 0.000000e+00 : f32
    %6 = vector.broadcast %cst_5 : f32 to vector<2x32xf32>
    %7 = arith.maximumf %5, %6 : vector<2x32xf32>
    %c0_6 = arith.constant 0 : index
    %c0_7 = arith.constant 0 : index
    %8 = vector.load %arg4[%c0_6, %c0_7] : memref<32x32xf32, #tpu.memory_space<vmem>>, vector<32x32xf32>
    %c0_8 = arith.constant 0 : index
    %c0_9 = arith.constant 0 : index
    %9 = vector.load %arg5[%c0_8, %c0_9] : memref<1x32xf32, #tpu.memory_space<vmem>>, vector<1x32xf32>
    %cst_10 = arith.constant dense<0.000000e+00> : vector<2x32xf32>
    %10 = tpu.matmul %7, %8, %cst_10 {dimension_numbers = #tpu.dot_dimension_numbers<[1], [0], [0], [1], [0, 0, 1, 1], [], []>} : vector<2x32xf32>, vector<32x32xf32>, vector<2x32xf32> -> vector<2x32xf32>
    %11 = vector.broadcast %9 : vector<1x32xf32> to vector<2x32xf32>
    %12 = arith.addf %10, %11 : vector<2x32xf32>
    %cst_11 = arith.constant 0.000000e+00 : f32
    %13 = vector.broadcast %cst_11 : f32 to vector<2x32xf32>
    %14 = arith.maximumf %12, %13 : vector<2x32xf32>
    %c0_12 = arith.constant 0 : index
    %c0_13 = arith.constant 0 : index
    %15 = vector.load %arg6[%c0_12, %c0_13] : memref<32x10xf32, #tpu.memory_space<vmem>>, vector<32x10xf32>
    %c0_14 = arith.constant 0 : index
    %c0_15 = arith.constant 0 : index
    %16 = vector.load %arg7[%c0_14, %c0_15] : memref<1x10xf32, #tpu.memory_space<vmem>>, vector<1x10xf32>
    %cst_16 = arith.constant dense<0.000000e+00> : vector<2x10xf32>
    %17 = tpu.matmul %14, %15, %cst_16 {dimension_numbers = #tpu.dot_dimension_numbers<[1], [0], [0], [1], [0, 0, 1, 1], [], []>} : vector<2x32xf32>, vector<32x10xf32>, vector<2x10xf32> -> vector<2x10xf32>
    %18 = vector.broadcast %16 : vector<1x10xf32> to vector<2x10xf32>
    %19 = arith.addf %17, %18 : vector<2x10xf32>
    %c0_17 = arith.constant 0 : index
    %c0_18 = arith.constant 0 : index
    %20 = vector.load %arg8[%c0_17, %c0_18] : memref<2x10xf32, #tpu.memory_space<vmem>>, vector<2x10xf32>
    tpu.vector_store %arg8[%c0_17, %c0_18], %19 {strides = array<i32>} : memref<2x10xf32, #tpu.memory_space<vmem>>, vector<2x10xf32>,
    return
  }
  func.func @transform_0(%arg0: i32) -> (i32, i32) {
    %c0_i32 = arith.constant 0 : i32
    %c0_i32_0 = arith.constant 0 : i32
    return %arg0, %c0_i32 : i32, i32
  }
  func.func @transform_1(%arg0: i32) -> (i32, i32) {
    %c0_i32 = arith.constant 0 : i32
    %c0_i32_0 = arith.constant 0 : i32
    %c0_i32_1 = arith.constant 0 : i32
    return %c0_i32, %c0_i32_0 : i32, i32
  }
  func.func @transform_2(%arg0: i32) -> (i32, i32) {
    %c0_i32 = arith.constant 0 : i32
    %c0_i32_0 = arith.constant 0 : i32
    %c0_i32_1 = arith.constant 0 : i32
    return %c0_i32, %c0_i32_0 : i32, i32
  }
  func.func @transform_3(%arg0: i32) -> (i32, i32) {
    %c0_i32 = arith.constant 0 : i32
    %c0_i32_0 = arith.constant 0 : i32
    %c0_i32_1 = arith.constant 0 : i32
    return %c0_i32, %c0_i32_0 : i32, i32
  }
  func.func @transform_4(%arg0: i32) -> (i32, i32) {
    %c0_i32 = arith.constant 0 : i32
    %c0_i32_0 = arith.constant 0 : i32
    %c0_i32_1 = arith.constant 0 : i32
    return %c0_i32, %c0_i32_0 : i32, i32
  }
  func.func @transform_5(%arg0: i32) -> (i32, i32) {
    %c0_i32 = arith.constant 0 : i32
    %c0_i32_0 = arith.constant 0 : i32
    %c0_i32_1 = arith.constant 0 : i32
    return %c0_i32, %c0_i32_0 : i32, i32
  }
  func.func @transform_6(%arg0: i32) -> (i32, i32) {
    %c0_i32 = arith.constant 0 : i32
    %c0_i32_0 = arith.constant 0 : i32
    %c0_i32_1 = arith.constant 0 : i32
    return %c0_i32, %c0_i32_0 : i32, i32
  }
  func.func @transform_7(%arg0: i32) -> (i32, i32) {
    %c0_i32 = arith.constant 0 : i32
    %c0_i32_0 = arith.constant 0 : i32
    return %arg0, %c0_i32 : i32, i32
  }
}

</mosaic_0001>

<bundles_post_ra>
// kernel: mlp_forward_pallas.1
= control target key start
LH: loop header
LB: loop body
LE: loop exit
PB: predicated region body
PF: predicated region fallthrough
CT: control target
= control target key end

     0   :  { %v1023_v47 = vmov 1983009808   ;;  %v170_v49 = vlaneseq  ;;  %s1514_s0 = inlined_call_operand.vmem [shape: f32[2,1024], index: 0, kind: input, shape index: {}]   ;;  %s1515_s1 = inlined_call_operand.vmem [shape: f32[1024,32], index: 1, kind: input, shape index: {}]   ;;  %s1516_s2 = inlined_call_operand.vmem [shape: f32[1,32], index: 2, kind: input, shape index: {}]   ;;  %s1517_s3 = inlined_call_operand.vmem [shape: f32[32,32], index: 3, kind: input, shape index: {}]   ;;  %s1518_s4 = inlined_call_operand.vmem [shape: f32[1,32], index: 4, kind: input, shape index: {}]   ;;  %s1519_s5 = inlined_call_operand.vmem [shape: f32[32,10], index: 5, kind: input, shape index: {}]   ;;  %s1520_s6 = inlined_call_operand.vmem [shape: f32[1,10], index: 6, kind: input, shape index: {}]   ;;  %s1521_s7 = inlined_call_operand.hbm [shape: f32[2,10], index: 7, kind: output, shape index: {}]  }
   0x1   :  { %v45_v0 = vld [vmem:[%s1515_s1 + $0x80] sm:$0xff]  ;;  %v46_v1 = vld [vmem:[%s1515_s1 + $0x88] sm:$0xff]  ;;  %v47_v11 = vld [vmem:[%s1515_s1 + $0x90] sm:$0xff]  ;;  %v168_v48 = vunpack.c.l.s4 %v1023_v47 }
   0x2   :  { %v29_v2 = vld [vmem:[%s1515_s1] sm:$0xff]  ;;  %v852_v3 = vpack.c.bf16 %v46_v1, %v45_v0  ;;  %v30_v4 = vld [vmem:[%s1515_s1 + $0x8] sm:$0xff]  ;;  %v48_v13 = vld [vmem:[%s1515_s1 + $0x98] sm:$0xff]  ;;  %v171_v0 = vshrl.u32 %v170_v49, 7 }
   0x3   :  { %v77_v5 = vld [vmem:[%s1515_s1 + $0x180] sm:$0xff]  ;;  %v78_v6 = vld [vmem:[%s1515_s1 + $0x188] sm:$0xff]  ;;  %v854_v7 = vpack.c.bf16 %v30_v4, %v29_v2  ;;  %v31_v14 = vld [vmem:[%s1515_s1 + $0x10] sm:$0xff]  ;;  %v856_v16 = vpack.c.bf16 %v48_v13, %v47_v11  ;;  %v169_v63 = vunpack.c.0.s8 %v168_v48 }
   0x4   :  { %v884_v8 = vpack.c.bf16 %v78_v6, %v77_v5  ;;  %v61_v9 = vld [vmem:[%s1515_s1 + $0x100] sm:$0xff]  ;;  %v62_v10 = vld [vmem:[%s1515_s1 + $0x108] sm:$0xff]  ;;  %853 = vmatprep.subr.bf16.mxu0 %v852_v3  ;;  %v32_v15 = vld [vmem:[%s1515_s1 + $0x18] sm:$0xff] }
   0x5   :  { %v886_v12 = vpack.c.bf16 %v62_v10, %v61_v9  ;;  %855 = vmatpush3.bf16.msra.mxu0 %v854_v7  ;;  %v858_v17 = vpack.c.bf16 %v32_v15, %v31_v14  ;;  %v79_v18 = vld [vmem:[%s1515_s1 + $0x190] sm:$0xff]  ;;  %v80_v19 = vld [vmem:[%s1515_s1 + $0x198] sm:$0xff]  ;;  %v49_v23 = vld [vmem:[%s1515_s1 + $0xa0] sm:$0xff]  ;;  %v1218_v13 = vsub.s32 %v169_v63, %v171_v0 }
   0x6   :  { %885 = vmatprep.subr.bf16.mxu1 %v884_v8  ;;  %v63_v20 = vld [vmem:[%s1515_s1 + $0x110] sm:$0xff]  ;;  %v888_v21 = vpack.c.bf16 %v80_v19, %v79_v18  ;;  %v64_v22 = vld [vmem:[%s1515_s1 + $0x118] sm:$0xff]  ;;  %v50_v24 = vld [vmem:[%s1515_s1 + $0xa8] sm:$0xff]  ;;  %857 = vmatprep.subr.bf16.mxu0 %v856_v16 }
   0x7   :  { %887 = vmatpush3.bf16.msra.mxu1 %v886_v12  ;;  %v890_v25 = vpack.c.bf16 %v64_v22, %v63_v20  ;;  %v860_v26 = vpack.c.bf16 %v50_v24, %v49_v23  ;;  %v33_v27 = vld [vmem:[%s1515_s1 + $0x20] sm:$0xff]  ;;  %v34_v28 = vld [vmem:[%s1515_s1 + $0x28] sm:$0xff]  ;;  %v51_v35 = vld [vmem:[%s1515_s1 + $0xb0] sm:$0xff] }
   0x8   :  { %v81_v29 = vld [vmem:[%s1515_s1 + $0x1a0] sm:$0xff]  ;;  %889 = vmatprep.subr.bf16.mxu1 %v888_v21  ;;  %v82_v30 = vld [vmem:[%s1515_s1 + $0x1a8] sm:$0xff]  ;;  %v862_v33 = vpack.c.bf16 %v34_v28, %v33_v27  ;;  %v52_v36 = vld [vmem:[%s1515_s1 + $0xb8] sm:$0xff] }
   0x9   :  { %v65_v31 = vld [vmem:[%s1515_s1 + $0x120] sm:$0xff]  ;;  %v66_v32 = vld [vmem:[%s1515_s1 + $0x128] sm:$0xff]  ;;  %859 = vmatpush3.bf16.msra.mxu0 %v858_v17  ;;  %v892_v34 = vpack.c.bf16 %v82_v30, %v81_v29  ;;  %v35_v37 = vld [vmem:[%s1515_s1 + $0x30] sm:$0xff]  ;;  %v864_v39 = vpack.c.bf16 %v52_v36, %v51_v35 }
   0xa   :  { %861 = vmatprep.subr.bf16.mxu0 %v860_v26  ;;  %v894_v38 = vpack.c.bf16 %v66_v32, %v65_v31  ;;  %v36_v40 = vld [vmem:[%s1515_s1 + $0x38] sm:$0xff]  ;;  %v83_v41 = vld [vmem:[%s1515_s1 + $0x1b0] sm:$0xff]  ;;  %v53_v46 = vld [vmem:[%s1515_s1 + $0xc0] sm:$0xff] }
   0xb   :  { %891 = vmatpush3.bf16.msra.mxu1 %v890_v25  ;;  %v84_v42 = vld [vmem:[%s1515_s1 + $0x1b8] sm:$0xff]  ;;  %v67_v44 = vld [vmem:[%s1515_s1 + $0x130] sm:$0xff]  ;;  %v54_v50 = vld [vmem:[%s1515_s1 + $0xc8] sm:$0xff]  ;;  %v866_v51 = vpack.c.bf16 %v36_v40, %v35_v37 }
   0xc   :  { %893 = vmatprep.subr.bf16.mxu1 %v892_v34  ;;  %v896_v43 = vpack.c.bf16 %v84_v42, %v83_v41  ;;  %v68_v45 = vld [vmem:[%s1515_s1 + $0x138] sm:$0xff]  ;;  %v85_v52 = vld [vmem:[%s1515_s1 + $0x1c0] sm:$0xff]  ;;  %v86_v53 = vld [vmem:[%s1515_s1 + $0x1c8] sm:$0xff]  ;;  %v868_v55 = vpack.c.bf16 %v54_v50, %v53_v46 }
   0xd   :  { %863 = vmatpush3.bf16.msra.mxu0 %v862_v33  ;;  %v898_v54 = vpack.c.bf16 %v68_v45, %v67_v44  ;;  %v37_v56 = vld [vmem:[%s1515_s1 + $0x40] sm:$0xff]  ;;  %v38_v57 = vld [vmem:[%s1515_s1 + $0x48] sm:$0xff]  ;;  %v900_v59 = vpack.c.bf16 %v86_v53, %v85_v52  ;;  %v55_v61 = vld [vmem:[%s1515_s1 + $0xd0] sm:$0xff] }
   0xe   :  { %865 = vmatprep.subr.bf16.mxu0 %v864_v39  ;;  %v69_v58 = vld [vmem:[%s1515_s1 + $0x140] sm:$0xff]  ;;  %v70_v60 = vld [vmem:[%s1515_s1 + $0x148] sm:$0xff]  ;;  %v56_v62 = vld [vmem:[%s1515_s1 + $0xd8] sm:$0xff]  ;;  %v870_v3 = vpack.c.bf16 %v38_v57, %v37_v56 }
   0xf   :  { %895 = vmatpush3.bf16.msra.mxu1 %v894_v38  ;;  %v87_v1 = vld [vmem:[%s1515_s1 + $0x1d0] sm:$0xff]  ;;  %v88_v2 = vld [vmem:[%s1515_s1 + $0x1d8] sm:$0xff]  ;;  %v902_v4 = vpack.c.bf16 %v70_v60, %v69_v58  ;;  %v872_v5 = vpack.c.bf16 %v56_v62, %v55_v61  ;;  %v57_v11 = vld [vmem:[%s1515_s1 + $0xe0] sm:$0xff] }
  0x10   :  { %897 = vmatprep.subr.bf16.mxu1 %v896_v43  ;;  %v39_v6 = vld [vmem:[%s1515_s1 + $0x50] sm:$0xff]  ;;  %v40_v7 = vld [vmem:[%s1515_s1 + $0x58] sm:$0xff]  ;;  %v904_v9 = vpack.c.bf16 %v88_v2, %v87_v1  ;;  %v58_v12 = vld [vmem:[%s1515_s1 + $0xe8] sm:$0xff] }
  0x11   :  { %867 = vmatpush3.bf16.msra.mxu0 %v866_v51  ;;  %v71_v8 = vld [vmem:[%s1515_s1 + $0x150] sm:$0xff]  ;;  %v72_v10 = vld [vmem:[%s1515_s1 + $0x158] sm:$0xff]  ;;  %v89_v14 = vld [vmem:[%s1515_s1 + $0x1e0] sm:$0xff]  ;;  %v874_v16 = vpack.c.bf16 %v40_v7, %v39_v6  ;;  %v876_v19 = vpack.c.bf16 %v58_v12, %v57_v11 }
  0x12   :  { %869 = vmatprep.subr.bf16.mxu0 %v868_v55  ;;  %v90_v15 = vld [vmem:[%s1515_s1 + $0x1e8] sm:$0xff]  ;;  %v41_v17 = vld [vmem:[%s1515_s1 + $0x60] sm:$0xff]  ;;  %v906_v18 = vpack.c.bf16 %v72_v10, %v71_v8  ;;  %v59_v25 = vld [vmem:[%s1515_s1 + $0xf0] sm:$0xff] }
  0x13   :  { %899 = vmatpush3.bf16.msra.mxu1 %v898_v54  ;;  %v42_v20 = vld [vmem:[%s1515_s1 + $0x68] sm:$0xff]  ;;  %v73_v21 = vld [vmem:[%s1515_s1 + $0x160] sm:$0xff]  ;;  %v908_v23 = vpack.c.bf16 %v90_v15, %v89_v14  ;;  %v60_v26 = vld [vmem:[%s1515_s1 + $0xf8] sm:$0xff] }
  0x14   :  { %901 = vmatprep.subr.bf16.mxu1 %v900_v59  ;;  %v27_v22 = vld [vmem:[%s1514_s0] sm:$0xff]  ;;  %v74_v24 = vld [vmem:[%s1515_s1 + $0x168] sm:$0xff]  ;;  %v91_v29 = vld [vmem:[%s1515_s1 + $0x1f0] sm:$0xff]  ;;  %v878_v31 = vpack.c.bf16 %v42_v20, %v41_v17  ;;  %v880_v35 = vpack.c.bf16 %v60_v26, %v59_v25 }
  0x15   :  { %871 = vmatpush3.bf16.msra.mxu0 %v870_v3  ;;  %v173_v27 = vrot.slane %v27_v22, %v1218_v13  ;;  %v166_v28 = vcombine.high %v27_v22, %v27_v22  ;;  %v92_v30 = vld [vmem:[%s1515_s1 + $0x1f8] sm:$0xff]  ;;  %v910_v34 = vpack.c.bf16 %v74_v24, %v73_v21  ;;  %v43_v36 = vld [vmem:[%s1515_s1 + $0x70] sm:$0xff]  ;;  %v109_v41 = vld [vmem:[%s1515_s1 + $0x280] sm:$0xff] }
  0x16   :  { %873 = vmatprep.subr.bf16.mxu0 %v872_v5  ;;  %v44_v37 = vld [vmem:[%s1515_s1 + $0x78] sm:$0xff]  ;;  %v75_v38 = vld [vmem:[%s1515_s1 + $0x170] sm:$0xff]  ;;  %v912_v39 = vpack.c.bf16 %v92_v30, %v91_v29  ;;  %v110_v42 = vld [vmem:[%s1515_s1 + $0x288] sm:$0xff] }
  0x17   :  { %903 = vmatpush3.bf16.msra.mxu1 %v902_v4  ;;  %v181_v32 = vcombine.high %v173_v27, %v173_v27  ;;  %v180_v33 = vrot.slane %v166_v28, %v1218_v13  ;;  %v76_v40 = vld [vmem:[%s1515_s1 + $0x178] sm:$0xff]  ;;  %v141_v44 = vld [vmem:[%s1515_s1 + $0x380] sm:$0xff]  ;;  %v142_v45 = vld [vmem:[%s1515_s1 + $0x388] sm:$0xff]  ;;  %v882_v46 = vpack.c.bf16 %v44_v37, %v43_v36  ;;  %v916_v48 = vpack.c.bf16 %v110_v42, %v109_v41 }
  0x18   :  { %905 = vmatprep.subr.bf16.mxu1 %v904_v9  ;;  %v914_v47 = vpack.c.bf16 %v76_v40, %v75_v38  ;;  %v93_v49 = vld [vmem:[%s1515_s1 + $0x200] sm:$0xff]  ;;  %v94_v50 = vld [vmem:[%s1515_s1 + $0x208] sm:$0xff]  ;;  %v948_v52 = vpack.c.bf16 %v142_v45, %v141_v44  ;;  %v111_v54 = vld [vmem:[%s1515_s1 + $0x290] sm:$0xff] }
  0x19   :  { %875 = vmatpush3.bf16.msra.mxu0 %v874_v16  ;;  %272 = vmatprep.mubr.f32.mxu0 %v181_v32  ;;  %v182_v43 = vcombine.high %v180_v33, %v180_v33  ;;  %v125_v51 = vld [vmem:[%s1515_s1 + $0x300] sm:$0xff]  ;;  %v126_v53 = vld [vmem:[%s1515_s1 + $0x308] sm:$0xff]  ;;  %v112_v55 = vld [vmem:[%s1515_s1 + $0x298] sm:$0xff]  ;;  %v918_v58 = vpack.c.bf16 %v94_v50, %v93_v49 }
  0x1a   :  { %877 = vmatprep.subr.bf16.mxu0 %v876_v19  ;;  %v143_v56 = vld [vmem:[%s1515_s1 + $0x390] sm:$0xff]  ;;  %v144_v57 = vld [vmem:[%s1515_s1 + $0x398] sm:$0xff]  ;;  %v950_v59 = vpack.c.bf16 %v126_v53, %v125_v51  ;;  %v920_v60 = vpack.c.bf16 %v112_v55, %v111_v54  ;;  %v113_v2 = vld [vmem:[%s1515_s1 + $0x2a0] sm:$0xff] }
  0x1b   :  { %907 = vmatpush3.bf16.msra.mxu1 %v906_v18  ;;  %342 = vmatprep.mubr.f32.mxu1 %v182_v43  ;;  %v95_v61 = vld [vmem:[%s1515_s1 + $0x210] sm:$0xff]  ;;  %v96_v62 = vld [vmem:[%s1515_s1 + $0x218] sm:$0xff]  ;;  %v952_v0 = vpack.c.bf16 %v144_v57, %v143_v56  ;;  %v114_v3 = vld [vmem:[%s1515_s1 + $0x2a8] sm:$0xff] }
  0x1c   :  { %909 = vmatprep.subr.bf16.mxu1 %v908_v23  ;;  %v127_v63 = vld [vmem:[%s1515_s1 + $0x310] sm:$0xff]  ;;  %v128_v1 = vld [vmem:[%s1515_s1 + $0x318] sm:$0xff]  ;;  %v145_v4 = vld [vmem:[%s1515_s1 + $0x3a0] sm:$0xff]  ;;  %v922_v6 = vpack.c.bf16 %v96_v62, %v95_v61  ;;  %v924_v8 = vpack.c.bf16 %v114_v3, %v113_v2 }
  0x1d   :  { %879 = vmatpush3.bf16.msra.mxu0 %v878_v31  ;;  %v146_v5 = vld [vmem:[%s1515_s1 + $0x3a8] sm:$0xff]  ;;  %v954_v7 = vpack.c.bf16 %v128_v1, %v127_v63  ;;  %v97_v9 = vld [vmem:[%s1515_s1 + $0x220] sm:$0xff]  ;;  %v115_v15 = vld [vmem:[%s1515_s1 + $0x2b0] sm:$0xff] }
  0x1e   :  { %881 = vmatprep.subr.bf16.mxu0 %v880_v35  ;;  %v98_v10 = vld [vmem:[%s1515_s1 + $0x228] sm:$0xff]  ;;  %v129_v11 = vld [vmem:[%s1515_s1 + $0x320] sm:$0xff]  ;;  %v956_v12 = vpack.c.bf16 %v146_v5, %v145_v4  ;;  %v116_v16 = vld [vmem:[%s1515_s1 + $0x2b8] sm:$0xff] }
  0x1f   :  { %911 = vmatpush3.bf16.msra.mxu1 %v910_v34  ;;  %v130_v14 = vld [vmem:[%s1515_s1 + $0x328] sm:$0xff]  ;;  %v147_v17 = vld [vmem:[%s1515_s1 + $0x3b0] sm:$0xff]  ;;  %v148_v18 = vld [vmem:[%s1515_s1 + $0x3b8] sm:$0xff]  ;;  %v926_v19 = vpack.c.bf16 %v98_v10, %v97_v9  ;;  %v928_v22 = vpack.c.bf16 %v116_v16, %v115_v15 }
  0x20   :  { %913 = vmatprep.subr.bf16.mxu1 %v912_v39  ;;  %v99_v20 = vld [vmem:[%s1515_s1 + $0x230] sm:$0xff]  ;;  %v958_v21 = vpack.c.bf16 %v130_v14, %v129_v11  ;;  %v100_v23 = vld [vmem:[%s1515_s1 + $0x238] sm:$0xff]  ;;  %v960_v26 = vpack.c.bf16 %v148_v18, %v147_v17  ;;  %v118_v28 = vld [vmem:[%s1515_s1 + $0x2c8] sm:$0xff] }
  0x21   :  { %883 = vmatpush3.bf16.msra.mxu0 %v882_v46  ;;  %v131_v24 = vld [vmem:[%s1515_s1 + $0x330] sm:$0xff]  ;;  %v132_v25 = vld [vmem:[%s1515_s1 + $0x338] sm:$0xff]  ;;  %v149_v29 = vld [vmem:[%s1515_s1 + $0x3c0] sm:$0xff] }
  0x22   :  { %917 = vmatprep.subr.bf16.mxu0 %v916_v48  ;;  %v150_v30 = vld [vmem:[%s1515_s1 + $0x3c8] sm:$0xff] }
  0x23   :  { %915 = vmatpush3.bf16.msra.mxu1 %v914_v47  ;;  %v28_v31 = vld [vmem:[%s1514_s0 + $0x8] sm:$0xff] }
  0x24   :  { %949 = vmatprep.subr.bf16.mxu1 %v948_v52  ;;  %273 = vmatmul.mubr.f32.vlgmr.msra.gmra.mrb[0].mxu0 %v173_v27  ;;  %v117_v27 = vld [vmem:[%s1515_s1 + $0x2c0] sm:$0xff] }
  0x25   :  { %919 = vmatpush3.bf16.msra.mxu0 %v918_v58 }
  0x26   :  { %343 = vmatmul.mubr.f32.vlgmr.msra.gmra.mrb[0].mxu1 %v180_v33  ;;  %921 = vmatprep.subr.bf16.mxu0 %v920_v60 }
  0x27   :  { %951 = vmatpush3.bf16.msra.mxu1 %v950_v59 }
  0x28   :  { %953 = vmatprep.subr.bf16.mxu1 %v952_v0 }
  0x29   :  { %923 = vmatpush3.bf16.msra.mxu0 %v922_v6 }
  0x2a   :  { %925 = vmatprep.subr.bf16.mxu0 %v924_v8 }
  0x2b   :  { %955 = vmatpush3.bf16.msra.mxu1 %v954_v7 }
  0x2c   :  { %957 = vmatprep.subr.bf16.mxu1 %v956_v12 }
  0x2d   :  { %12 = vsyncpa [#allocation3], 0  ;;  %927 = vmatpush3.bf16.msra.mxu0 %v926_v19  ;;  %v930_v32 = vpack.c.bf16 %v100_v23, %v99_v20  ;;  %v1379_v33 = vrot.slane %v28_v31, %v1218_v13  ;;  %v183_v34 = vcombine.high %v28_v31, %v28_v31  ;;  %v962_v35 = vpack.c.bf16 %v132_v25, %v131_v24  ;;  %v101_v37 = vld [vmem:[%s1515_s1 + $0x240] sm:$0xff]  ;;  %v102_v38 = vld [vmem:[%s1515_s1 + $0x248] sm:$0xff]  ;;  %s1027_s24 = smov [#allocation2]  }
  0x2e   :  { %929 = vmatprep.subr.bf16.mxu0 %v928_v22  ;;  %v932_v36 = vpack.c.bf16 %v118_v28, %v117_v27  ;;  %v133_v39 = vld [vmem:[%s1515_s1 + $0x340] sm:$0xff]  ;;  %v964_v40 = vpack.c.bf16 %v150_v30, %v149_v29  ;;  %v134_v41 = vld [vmem:[%s1515_s1 + $0x348] sm:$0xff]  ;;  %v119_v42 = vld [vmem:[%s1515_s1 + $0x2d0] sm:$0xff]  ;;  %v934_v48 = vpack.c.bf16 %v102_v38, %v101_v37  ;;  %v1024_v22 = vmov 0.0|0.0   ;;  %s667_s0 = sshll.u32 %s1027_s24, 4  ;;  %s668_s0 = int_to_ptr.vmem [resolvable:$true] %s667_s0 }
  0x2f   :  { %959 = vmatpush3.bf16.msra.mxu1 %v958_v21  ;;  %v120_v43 = vld [vmem:[%s1515_s1 + $0x2d8] sm:$0xff]  ;;  %v198_v44 = vcombine.high %v1379_v33, %v1379_v33  ;;  %v197_v45 = vrot.slane %v183_v34, %v1218_v13  ;;  %v151_v46 = vld [vmem:[%s1515_s1 + $0x3d0] sm:$0xff]  ;;  %v966_v50 = vpack.c.bf16 %v134_v41, %v133_v39  ;;  %v121_v56 = vld [vmem:[%s1515_s1 + $0x2e0] sm:$0xff]  ;;  %vm1025_vm0 = vmmov 0   ;;  %p1004_p1 = scmp.lt.s32.totalorder %s668_s0, %s668_s0 }
  0x30   :  { %961 = vmatprep.subr.bf16.mxu1 %v960_v26  ;;  %v152_v47 = vld [vmem:[%s1515_s1 + $0x3d8] sm:$0xff]  ;;  %v936_v51 = vpack.c.bf16 %v120_v43, %v119_v42  ;;  %v103_v13 = vld [vmem:[%s1515_s1 + $0x250] sm:$0xff]  ;;  %v122_v57 = vld [vmem:[%s1515_s1 + $0x2e8] sm:$0xff]  ;;  %v1026_v26 = vmov 0.0   ;;  %vm500_vm1 = vcmask 261120   ;;  %vm659_vm2 = vcmask 74752  }
  0x31   :  { %931 = vmatpush3.bf16.msra.mxu0 %v930_v32  ;;  %412 = vmatprep.mubr.f32.mxu0 %v198_v44  ;;  %v199_v49 = vcombine.high %v197_v45, %v197_v45  ;;  %v104_v52 = vld [vmem:[%s1515_s1 + $0x258] sm:$0xff]  ;;  %v135_v53 = vld [vmem:[%s1515_s1 + $0x350] sm:$0xff]  ;;  %v968_v54 = vpack.c.bf16 %v152_v47, %v151_v46  ;;  %v153_v58 = vld [vmem:[%s1515_s1 + $0x3e0] sm:$0xff]  ;;  %v940_v62 = vpack.c.bf16 %v122_v57, %v121_v56 }
  0x32   :  { %933 = vmatprep.subr.bf16.mxu0 %v932_v36  ;;  %v136_v55 = vld [vmem:[%s1515_s1 + $0x358] sm:$0xff]  ;;  %v154_v59 = vld [vmem:[%s1515_s1 + $0x3e8] sm:$0xff]  ;;  %v938_v60 = vpack.c.bf16 %v104_v52, %v103_v13  ;;  %v105_v63 = vld [vmem:[%s1515_s1 + $0x260] sm:$0xff] }
  0x33   :  { %963 = vmatpush3.bf16.msra.mxu1 %v962_v35  ;;  %482 = vmatprep.mubr.f32.mxu1 %v199_v49  ;;  %v970_v61 = vpack.c.bf16 %v136_v55, %v135_v53  ;;  %v106_v0 = vld [vmem:[%s1515_s1 + $0x268] sm:$0xff]  ;;  %v137_v1 = vld [vmem:[%s1515_s1 + $0x360] sm:$0xff]  ;;  %v972_v2 = vpack.c.bf16 %v154_v59, %v153_v58  ;;  %v123_v4 = vld [vmem:[%s1515_s1 + $0x2f0] sm:$0xff] }
  0x34   :  { %965 = vmatprep.subr.bf16.mxu1 %v964_v40  ;;  %v138_v3 = vld [vmem:[%s1515_s1 + $0x368] sm:$0xff]  ;;  %v124_v5 = vld [vmem:[%s1515_s1 + $0x2f8] sm:$0xff]  ;;  %v155_v6 = vld [vmem:[%s1515_s1 + $0x3f0] sm:$0xff]  ;;  %v942_v8 = vpack.c.bf16 %v106_v0, %v105_v63 }
  0x35   :  { %935 = vmatpush3.bf16.msra.mxu0 %v934_v48  ;;  %v156_v7 = vld [vmem:[%s1515_s1 + $0x3f8] sm:$0xff]  ;;  %v974_v9 = vpack.c.bf16 %v138_v3, %v137_v1  ;;  %v944_v10 = vpack.c.bf16 %v124_v5, %v123_v4  ;;  %v107_v11 = vld [vmem:[%s1515_s1 + $0x270] sm:$0xff]  ;;  %v489_v19 = vld [vmem:[%s1517_s3] sm:$0xff] }
  0x36   :  { %937 = vmatprep.subr.bf16.mxu0 %v936_v51  ;;  %v108_v12 = vld [vmem:[%s1515_s1 + $0x278] sm:$0xff]  ;;  %v976_v14 = vpack.c.bf16 %v156_v7, %v155_v6  ;;  %v139_v15 = vld [vmem:[%s1515_s1 + $0x370] sm:$0xff]  ;;  %v490_v20 = vld [vmem:[%s1517_s3 + $0x8] sm:$0xff] }
  0x37   :  { %967 = vmatpush3.bf16.msra.mxu1 %v966_v50  ;;  %v140_v16 = vld [vmem:[%s1515_s1 + $0x378] sm:$0xff]  ;;  %v946_v17 = vpack.c.bf16 %v108_v12, %v107_v11  ;;  %v981_v21 = vpack.c.bf16 %v490_v20, %v489_v19  ;;  %v491_v23 = vld [vmem:[%s1517_s3 + $0x10] sm:$0xff]  ;;  %v575_v27 = vld [vmem:[%s1519_s5] sm:$0xff] }
  0x38   :  { %969 = vmatprep.subr.bf16.mxu1 %v968_v54  ;;  %v978_v18 = vpack.c.bf16 %v140_v16, %v139_v15  ;;  %v492_v24 = vld [vmem:[%s1517_s3 + $0x18] sm:$0xff]  ;;  %v576_v28 = vld [vmem:[%s1519_s5 + $0x8] sm:$0xff]  ;;  %v675_v31 = vld [vmem:[%s1516_s2] ss:$0 sm:$0xff] }
  0x39   :  { %939 = vmatpush3.bf16.msra.mxu0 %v938_v60  ;;  %v984_v25 = vpack.c.bf16 %v492_v24, %v491_v23  ;;  %v987_v29 = vpack.c.bf16 %v576_v28, %v575_v27  ;;  %v577_v48 = vld [vmem:[%s1519_s5 + $0x10] sm:$0xff]  ;;  %v578_v49 = vld [vmem:[%s1519_s5 + $0x18] sm:$0xff]  ;;  %v676_v51 = vld [vmem:[%s1518_s4] ss:$0 sm:$0xff]  ;;  %s999_s5 = scalar_lea.vmem %s668_s0, 32 }
  0x3a   :  { %941 = vmatprep.subr.bf16.mxu0 %v940_v62  ;;  %v990_v50 = vpack.c.bf16 %v578_v49, %v577_v48  ;;  %v678_v55 = vld [vmem:[%s1520_s6] ss:$0 sm:$0xff]  ;;  %p1000_p0 = scmp.ne.s32.totalorder %s668_s0, %s999_s5  ;;  %p1005_p2 = scmp.lt.s32.totalorder %s999_s5, %s999_s5 }
  0x3b   :  { %971 = vmatpush3.bf16.msra.mxu1 %v970_v61 }
  0x3c   :  { %973 = vmatprep.subr.bf16.mxu1 %v972_v2  ;;  %p1006_p3 = por %p1005_p2, %p1004_p1 }
  0x3d   :  { %943 = vmatpush3.bf16.msra.mxu0 %v942_v8 }
  0x3e   :  { %945 = vmatprep.subr.bf16.mxu0 %v944_v10  ;;  %p1007_p4 = pnand %p1006_p3, %p1000_p0 }
  0x3f   :  { %975 = vmatpush3.bf16.msra.mxu1 %v974_v9 }
  0x40   :  { %977 = vmatprep.subr.bf16.mxu1 %v976_v14 }
  0x41   :  { %947 = vmatpush3.bf16.msra.mxu0 %v946_v17 }
  0x42   :  { %980 = vmatprep.subr.bf16.mxu0 %v1024_v22 }
  0x43   :  { %979 = vmatpush3.bf16.msra.mxu1 %v978_v18 }
  0x44   :  { %413 = vmatmul.mubr.f32.vlgmr.msra.gmra.mrb[2].mxu0 %v1379_v33  ;;  %986 = vmatprep.subr.bf16.mxu1 %v1024_v22 }
  0x45   :  { %982 = vmatpush3.bf16.msra.mxu0 %v981_v21  ;;  %838 = vmatprep.mubr.msk.f32.mxu0 %vm1025_vm0, %v1026_v26 }
  0x46   :  { %483 = vmatmul.mubr.f32.vlgmr.msra.gmra.mrb[2].mxu1 %v197_v45  ;;  %983 = vmatprep.subr.bf16.mxu0 %v1024_v22 }
  0x47   :  { %849 = vmatprep.mubr.msk.f32.mxu1 %vm1025_vm0, %v1026_v26  ;;  %988 = vmatpush3.bf16.msra.mxu1 %v987_v29 }
  0x48   :  { %989 = vmatprep.subr.bf16.mxu1 %v1024_v22 }
  0x49   :  { %985 = vmatpush3.bf16.msra.mxu0 %v984_v25 }
  0x4b   :  { %991 = vmatpush3.bf16.msra.mxu1 %v990_v50 }
  0xf7   :  { %v712_v30 = vpop.f32.mrb[0].mxu0 }
  0xf8   :  { %v713_v32 = vpop.f32.mrb[1].mxu0 }
  0xf9   :  { %v747_v33 = vpop.f32.mrb[0].mxu1  ;;  %v714_v34 = vadd.f32 %v713_v32, %v712_v30 }
  0xfa   :  { %v748_v35 = vpop.f32.mrb[1].mxu1 }
  0xfb   :  { %v749_v36 = vadd.f32 %v748_v35, %v747_v33  ;;  %v275_v37 = vadd.f32 %v714_v34, %v675_v31 }
  0xfd   :  { %v345_v38 = vadd.f32 %v749_v36, %v275_v37 }
 0x117   :  { %v782_v39 = vpop.f32.mrb[2].mxu0 }
 0x118   :  { %v783_v40 = vpop.f32.mrb[3].mxu0 }
 0x119   :  { %v817_v41 = vpop.f32.mrb[2].mxu1  ;;  %v784_v42 = vadd.f32 %v783_v40, %v782_v39 }
 0x11a   :  { %v818_v43 = vpop.f32.mrb[3].mxu1 }
 0x11b   :  { %v819_v44 = vadd.f32 %v818_v43, %v817_v41  ;;  %v415_v45 = vadd.f32 %v784_v42, %v345_v38 }
 0x11d   :  { %v485_v46 = vadd.f32 %v819_v44, %v415_v45 }
 0x11f   :  { %v488_v47 = vmax.f32 %v485_v46, 0.0 }
 0x121   :  { %839 = vmatmul.mubr.msk.f32.vlgmr.msra.gmra.mrb[4].mxu0 %vm500_vm1, %v488_v47 }
 0x1f4   :  { %v570_v13 = vpop.f32.mrb[4].mxu0 }
 0x1f5   :  { %v571_v52 = vadd.f32 %v676_v51, %v570_v13  ;;  %v840_v53 = vpop.f32.mrb[5].mxu0 }
 0x1f7   :  { %v574_v54 = vmax.f32 %v571_v52, 0.0 }
 0x1f9   :  { %850 = vmatmul.mubr.msk.f32.vlgmr.msra.gmra.mrb[4].mxu1 %vm500_vm1, %v574_v54 }
 0x2cc   :  { %v655_v56 = vpop.f32.mrb[4].mxu1 }
 0x2cd   :  { %v656_v57 = vadd.f32 %v678_v55, %v655_v56  ;;  %v851_v58 = vpop.f32.mrb[5].mxu1 }
 0x2cf   :  { %660 = vst.msk [vmem:[#allocation2] sm:$0x3] %vm659_vm2, %v656_v57 }
 0x2d0   :  { %1010 = shalt.err (!%p1007_p4)
}
 0x2d1   :  { %s1011_s26 = scalar_lea.hbm %s1521_s7, 32 }
 0x2d2   :  { %p1012_p5 = scmp.ne.s32.totalorder %s1521_s7, %s1011_s26  ;;  %p1015_p6 = scmp.lt.u32.totalorder %s1011_s26, %s1521_s7 }
 0x2d4   :  { %p1017_p7 = pnand %p1015_p6, %p1012_p5 }
 0x2d6   :  { %1020 = shalt.err (!%p1017_p7)
}
 0x2d7   :  { %670 = dma.vmem_to_hbm [thread:$0]  %s668_s0, 32, %s1521_s7, [#allocation3]  }
 0x2d8   :  { %1021 = dma.done.wait [#allocation3], 32  }
 0x2d9   :  { %1022 = vsyncadd [#allocation3], 4294967264 }
 0x2da   :  { %674 = vsyncpa [#allocation3], 1 }

</bundles_post_ra>
